<compile_context>
chip_gen: v7x
topology: tpu7x:2x2x1
jax: 0.10.0
libtpu: 0.0.40
codegen_flags: <defaults>
</compile_context>

<pallas_src>
import functools
import math

import jax
import jax.numpy as jnp
from jax import lax
from jax.experimental import pallas as pl
from jax.experimental.pallas import tpu as pltpu


# --------------------------- hardware-aware helpers ---------------------------

def _vmem_capacity_bytes():
    """Per-TensorCore VMEM capacity; falls back to the smallest current gen (v7x, 64 MiB)."""
    try:
        cap = getattr(pltpu.get_tpu_info(), "vmem_capacity_bytes", None)
        if cap:
            return int(cap)
    except Exception:
        pass
    return 64 * 1024 * 1024


def _mosaic_params(dim_sem, vmem_estimate_bytes):
    """CompilerParams; raise the scoped-VMEM limit only when the blocks actually need it."""
    kwargs = dict(dimension_semantics=dim_sem)
    if vmem_estimate_bytes > 16 * 1024 * 1024:
        kwargs["vmem_limit_bytes"] = int(
            min(max(vmem_estimate_bytes * 5 // 4, 32 * 1024 * 1024), 64 * 1024 * 1024))
    return pltpu.CompilerParams(**kwargs)


_TILES = (2048, 1024, 512, 256, 128, 64, 32, 16, 8)


def _row_tile(n, bytes_per_row, resident_bytes):
    """Largest row tile dividing n whose double-buffered blocks fit the VMEM budget."""
    budget = max(int(0.6 * _vmem_capacity_bytes()) - 2 * resident_bytes, 2 << 20)
    for tm in _TILES:
        if tm <= n and n % tm == 0 and 2 * tm * bytes_per_row <= budget:
            return tm
    return n


def _attn_tiles(T, D, H, compute_itemsize, out_itemsize):
    """(tq, tk) tiles for the flash kernel that fit the per-generation VMEM budget."""
    budget = max(int(0.6 * _vmem_capacity_bytes()) - 2 * D * D * compute_itemsize, 2 << 20)
    cand = [t for t in _TILES if t <= T and T % t == 0] or [T]
    for tq in cand:
        for tk in cand:
            need = (2 * tq * D * compute_itemsize        # q blocks (double-buffered)
                    + 2 * tk * 2 * D * compute_itemsize  # kv blocks (double-buffered)
                    + 2 * tq * D * out_itemsize          # output blocks
                    + tq * D * 4 + 2 * H * tq * 128 * 4  # acc / m / l scratch (padded)
                    + 4 * tq * tk * 4)                   # s / p temporaries (rough)
            if need <= budget:
                return tq, tk
    return cand[-1], cand[-1]


# ----------------------------- Pallas kernels ------------------------------

def qkv_self_kernel(x_ref, wt_ref, b_ref, q_ref, kv_ref, *, d_model, compute_dtype):
    """Self-attention QKV projection: one (tm, D) x (D, 3D) matmul, split into q / kv slabs."""
    D = d_model
    x = x_ref[...].astype(compute_dtype)
    y = jnp.dot(x, wt_ref[...], preferred_element_type=jnp.float32) + b_ref[...]
    q_ref[...] = y[:, :D].astype(q_ref.dtype)
    kv_ref[...] = y[:, D:].astype(kv_ref.dtype)


def qkv_cross_kernel(xq_ref, xk_ref, xv_ref, wt_ref, b_ref, q_ref, kv_ref,
                     *, d_model, compute_dtype):
    """Cross-attention QKV projection (separate q/k/v inputs, shared fused weight)."""
    D = d_model
    q = jnp.dot(xq_ref[...].astype(compute_dtype), wt_ref[:, :D],
                preferred_element_type=jnp.float32) + b_ref[:, :D]
    k = jnp.dot(xk_ref[...].astype(compute_dtype), wt_ref[:, D:2 * D],
                preferred_element_type=jnp.float32) + b_ref[:, D:2 * D]
    v = jnp.dot(xv_ref[...].astype(compute_dtype), wt_ref[:, 2 * D:],
                preferred_element_type=jnp.float32) + b_ref[:, 2 * D:]
    q_ref[...] = q.astype(q_ref.dtype)
    kv_ref[:, :D] = k.astype(kv_ref.dtype)
    kv_ref[:, D:] = v.astype(kv_ref.dtype)


def flash_attn_kernel(q_ref, kv_ref, wot_ref, bo_ref, o_ref,
                      acc_ref, m_ref, l_ref, *, nhead, d_k, compute_dtype):
    """Flash-style MHA for one (batch, q-tile): online softmax over the KV grid axis,
    fused output projection in the epilogue.  1/sqrt(d_k) is pre-folded into Wq."""
    ki = pl.program_id(2)
    nk = pl.num_programs(2)
    D = nhead * d_k

    @pl.when(ki == 0)
    def _init():
        m_ref[...] = jnp.full_like(m_ref, -jnp.inf)
        l_ref[...] = jnp.zeros_like(l_ref)
        acc_ref[...] = jnp.zeros_like(acc_ref)

    q = q_ref[...].astype(compute_dtype)          # (tq, D)
    k = kv_ref[:, :D].astype(compute_dtype)       # (tk, D)
    v = kv_ref[:, D:].astype(compute_dtype)       # (tk, D)

    # Static per-head loop; heads are lane slices (d_k = D/H).  With d_k=32 the binding
    # unit is the EUP softmax, not the MXU, so the narrow contraction is acceptable.
    # TODO(synk): if a bundle dump shows vreg spills at large T/H, move heads onto an
    #             'arbitrary' grid axis instead of unrolling here.
    for h in range(nhead):
        lo = h * d_k
        s = lax.dot_general(q[:, lo:lo + d_k], k[:, lo:lo + d_k],
                            (((1,), (1,)), ((), ())),
                            preferred_element_type=jnp.float32)          # (tq, tk)
        m_prev = m_ref[h]                                                # (tq, 1)
        m_new = jnp.maximum(m_prev, jnp.max(s, axis=-1, keepdims=True))
        alpha = jnp.exp(m_prev - m_new)
        # exp kept in f32 (safe on all generations; bf16 exp is a further v6e/v7x EUP win).
        p = jnp.exp(s - m_new)                                           # (tq, tk) f32
        l_ref[h] = alpha * l_ref[h] + jnp.sum(p, axis=-1, keepdims=True)
        acc_ref[:, lo:lo + d_k] = alpha * acc_ref[:, lo:lo + d_k] + jnp.dot(
            p.astype(compute_dtype), v[:, lo:lo + d_k],
            preferred_element_type=jnp.float32)
        m_ref[h] = m_new

    @pl.when(ki == nk - 1)
    def _finalize():
        for h in range(nhead):
            lo = h * d_k
            inv_h = pl.reciprocal(l_ref[h], approx=True)                 # (tq, 1)
            acc_ref[:, lo:lo + d_k] = acc_ref[:, lo:lo + d_k] * inv_h
        ctx = acc_ref[...].astype(compute_dtype)                         # (tq, D)
        y = jnp.dot(ctx, wot_ref[...], preferred_element_type=jnp.float32) + bo_ref[...]
        o_ref[...] = y.astype(o_ref.dtype)


def attn_probs_kernel(q_ref, kv_ref, wot_ref, bo_ref, o_ref, p_ref,
                      *, nhead, d_k, compute_dtype):
    """Debug path: full softmax per head, attention probabilities materialized, fused
    per-head output projection.  Uses exact division since the probs are returned."""
    D = nhead * d_k
    q = q_ref[...]
    k = kv_ref[:, :D]
    v = kv_ref[:, D:]
    y = jnp.zeros((q.shape[0], D), jnp.float32)
    for h in range(nhead):
        lo = h * d_k
        s = lax.dot_general(q[:, lo:lo + d_k], k[:, lo:lo + d_k],
                            (((1,), (1,)), ((), ())),
                            preferred_element_type=jnp.float32)          # (T, T)
        s = s - jnp.max(s, axis=-1, keepdims=True)
        e = jnp.exp(s)
        p = e / jnp.sum(e, axis=-1, keepdims=True)
        p_ref[h, 0] = p.astype(p_ref.dtype)
        ctx_h = jnp.dot(p.astype(compute_dtype), v[:, lo:lo + d_k],
                        preferred_element_type=jnp.float32)              # (T, d_k)
        y = y + jnp.dot(ctx_h.astype(compute_dtype), wot_ref[lo:lo + d_k, :],
                        preferred_element_type=jnp.float32)
    o_ref[...] = (y + bo_ref[...]).astype(o_ref.dtype)


# ------------------------------- wrappers -----------------------------------

def prepare_mha_params(params, nhead, compute_dtype=jnp.bfloat16):
    """One-time (outside the hot path) weight fusion / transpose / dtype prep.

    Folds 1/sqrt(d_k) into Wq and bq (exact w.r.t. the reference), stores
    [Wq|Wk|Wv]^T and Wo^T in the bf16 compute dtype; biases stay in f32."""
    D = params["wq"].shape[0]
    d_k = D // nhead
    scale = 1.0 / math.sqrt(d_k)
    wt_qkv = jnp.concatenate(
        [(params["wq"] * scale).T, params["wk"].T, params["wv"].T], axis=1)
    b_qkv = jnp.concatenate(
        [params["bq"] * scale, params["bk"], params["bv"]]).reshape(1, 3 * D)
    return {
        "wt_qkv": wt_qkv.astype(compute_dtype),          # (D, 3D)
        "b_qkv": b_qkv.astype(jnp.float32),              # (1, 3D)
        "wo_t": params["wo"].T.astype(compute_dtype),    # (D, D)
        "bo": params["bo"].reshape(1, D).astype(jnp.float32),
        "nhead": nhead,
        "d_model": D,
        "compute_dtype": compute_dtype,
    }


def _pallas_qkv_proj(xq, xk, xv, prepared, *, self_attn):
    N, D = xq.shape
    cd = prepared["compute_dtype"]
    cs = jnp.dtype(cd).itemsize
    wt, bias = prepared["wt_qkv"], prepared["b_qkv"]
    resident = wt.size * cs + bias.size * 4
    per_row = (1 if self_attn else 3) * D * xq.dtype.itemsize + 3 * D * cs
    tm = _row_tile(N, per_row, resident)

    x_spec = pl.BlockSpec((tm, D), lambda i: (i, 0))
    w_spec = pl.BlockSpec((D, 3 * D), lambda i: (0, 0))
    b_spec = pl.BlockSpec((1, 3 * D), lambda i: (0, 0))
    if self_attn:
        kernel = functools.partial(qkv_self_kernel, d_model=D, compute_dtype=cd)
        in_specs = [x_spec, w_spec, b_spec]
        args = (xq, wt, bias)
    else:
        kernel = functools.partial(qkv_cross_kernel, d_model=D, compute_dtype=cd)
        in_specs = [x_spec, x_spec, x_spec, w_spec, b_spec]
        args = (xq, xk, xv, wt, bias)

    vmem_est = 2 * resident + 2 * tm * per_row
    return pl.pallas_call(
        kernel,
        grid=(N // tm,),
        in_specs=in_specs,
        out_specs=(pl.BlockSpec((tm, D), lambda i: (i, 0)),
                   pl.BlockSpec((tm, 2 * D), lambda i: (i, 0))),
        out_shape=(jax.ShapeDtypeStruct((N, D), cd),
                   jax.ShapeDtypeStruct((N, 2 * D), cd)),
        compiler_params=_mosaic_params(("parallel",), vmem_est),
    )(*args)


def _pallas_flash_attn(q_slab, kv_slab, prepared, T, B, out_dtype, tq, tk):
    D = prepared["d_model"]
    H = prepared["nhead"]
    d_k = D // H
    cd = prepared["compute_dtype"]
    cs = jnp.dtype(cd).itemsize
    os = jnp.dtype(out_dtype).itemsize
    if tq is None or tk is None:
        atq, atk = _attn_tiles(T, D, H, cs, os)
        tq = tq or atq
        tk = tk or atk
    assert T % tq == 0 and T % tk == 0
    nq, nk = T // tq, T // tk

    kernel = functools.partial(flash_attn_kernel, nhead=H, d_k=d_k, compute_dtype=cd)
    vmem_est = (2 * tq * D * cs + 2 * tk * 2 * D * cs + 2 * tq * D * os
                + 2 * D * D * cs + tq * D * 4 + 2 * H * tq * 128 * 4 + 4 * tq * tk * 4)
    return pl.pallas_call(
        kernel,
        grid=(B, nq, nk),
        in_specs=[pl.BlockSpec((tq, D), lambda b, qi, ki: (qi, b)),
                  pl.BlockSpec((tk, 2 * D), lambda b, qi, ki: (ki, b)),
                  pl.BlockSpec((D, D), lambda b, qi, ki: (0, 0)),
                  pl.BlockSpec((1, D), lambda b, qi, ki: (0, 0))],
        out_specs=pl.BlockSpec((tq, D), lambda b, qi, ki: (qi, b)),
        out_shape=jax.ShapeDtypeStruct((T, B * D), out_dtype),
        scratch_shapes=[pltpu.VMEM((tq, D), jnp.float32),
                        pltpu.VMEM((H, tq, 1), jnp.float32),
                        pltpu.VMEM((H, tq, 1), jnp.float32)],
        compiler_params=_mosaic_params(("parallel", "parallel", "arbitrary"), vmem_est),
    )(q_slab, kv_slab, prepared["wo_t"], prepared["bo"])


def _pallas_attn_probs(q_slab, kv_slab, prepared, T, B, probs_dtype, out_dtype):
    D = prepared["d_model"]
    H = prepared["nhead"]
    d_k = D // H
    cd = prepared["compute_dtype"]
    cs = jnp.dtype(cd).itemsize
    kernel = functools.partial(attn_probs_kernel, nhead=H, d_k=d_k, compute_dtype=cd)
    vmem_est = (2 * T * 3 * D * cs + 2 * T * D * jnp.dtype(out_dtype).itemsize
                + 2 * D * D * cs + 2 * H * T * T * jnp.dtype(probs_dtype).itemsize
                + 3 * T * T * 4)
    return pl.pallas_call(
        kernel,
        grid=(B,),
        in_specs=[pl.BlockSpec((T, D), lambda b: (0, b)),
                  pl.BlockSpec((T, 2 * D), lambda b: (0, b)),
                  pl.BlockSpec((D, D), lambda b: (0, 0)),
                  pl.BlockSpec((1, D), lambda b: (0, 0))],
        out_specs=(pl.BlockSpec((T, D), lambda b: (0, b)),
                   pl.BlockSpec((H, 1, T, T), lambda b: (0, b, 0, 0))),
        out_shape=(jax.ShapeDtypeStruct((T, B * D), out_dtype),
                   jax.ShapeDtypeStruct((H, B, T, T), probs_dtype)),
        compiler_params=_mosaic_params(("parallel",), vmem_est),
    )(q_slab, kv_slab, prepared["wo_t"], prepared["bo"])


def multi_headed_attention(query, key, value, prepared, *, mask=None,
                           return_attn=False, is_self_attention=None,
                           probs_dtype=jnp.float32, tq=None, tk=None):
    """Pallas implementation of MultiHeadedAttention.forward (mask=None, eval mode).

    return_attn=False (default) is the performance path: flash attention, no probability
    materialization.  return_attn=True additionally returns p_attn of shape (H, B, T, T)."""
    # TODO(synk): mask support and train-mode dropout (p=0.1) on the attention
    #             probabilities are omitted (eval mode, mask=None only).
    assert mask is None, "mask is not supported by this Pallas port"
    T, B, D = query.shape
    H = prepared["nhead"]
    assert D == prepared["d_model"] and D % H == 0
    assert D % 128 == 0, "d_model must be a multiple of 128 (TPU lane width)"
    if is_self_attention is None:
        # NOTE: object identity misses duplicated-but-distinct traced args under jit;
        #       pass is_self_attention=True explicitly there (perf only, not numerics).
        is_self_attention = (query is key) and (key is value)

    N = T * B
    q_slab, kv_slab = _pallas_qkv_proj(query.reshape(N, D), key.reshape(N, D),
                                       value.reshape(N, D), prepared,
                                       self_attn=is_self_attention)
    # Free reshapes: rows are in (t, b) order, so batch b's columns are contiguous.
    q_slab = q_slab.reshape(T, B * D)
    kv_slab = kv_slab.reshape(T, B * 2 * D)

    if return_attn:
        out_slab, p_attn = _pallas_attn_probs(q_slab, kv_slab, prepared, T, B,
                                              probs_dtype, query.dtype)
    else:
        out_slab = _pallas_flash_attn(q_slab, kv_slab, prepared, T, B,
                                      query.dtype, tq, tk)
        p_attn = None

    return out_slab.reshape(T, B, D), p_attn


# ------------------------------ reference -----------------------------------

def reference_mha(query, key, value, params, nhead):
    T, B, D = query.shape
    H, dk = nhead, D // nhead
    with jax.default_matmul_precision("float32"):
        def proj(x, w, b):
            y = x.reshape(T * B, D) @ w.T + b
            return jnp.transpose(y.reshape(T, B, H, dk), (1, 2, 0, 3))

        q = proj(query, params["wq"], params["bq"])
        k = proj(key, params["wk"], params["bk"])
        v = proj(value, params["wv"], params["bv"])
        scores = jnp.einsum("bhqd,bhkd->bhqk", q, k) / math.sqrt(dk)
        p = jax.nn.softmax(scores, axis=-1)
        ctx = jnp.einsum("bhqk,bhkd->bhqd", p, v)
        x = jnp.transpose(ctx, (2, 0, 1, 3)).reshape(T * B, D)
        out = (x @ params["wo"].T + params["bo"]).reshape(T, B, D)
    return out, jnp.transpose(p, (1, 0, 2, 3))


# -------------------------------- main ---------------------------------------

if __name__ == "__main__":
    T, B, D, NHEAD = 16, 2, 128, 4  # tokens, batch, d_model, heads (d_k = 32)

    key_root = jax.random.PRNGKey(0)
    ks = jax.random.split(key_root, 12)
    scale_w = 1.0 / math.sqrt(D)
    params = {
        "wq": jax.random.normal(ks[0], (D, D), jnp.float32) * scale_w,
        "bq": jax.random.normal(ks[1], (D,), jnp.float32) * 0.1,
        "wk": jax.random.normal(ks[2], (D, D), jnp.float32) * scale_w,
        "bk": jax.random.normal(ks[3], (D,), jnp.float32) * 0.1,
        "wv": jax.random.normal(ks[4], (D, D), jnp.float32) * scale_w,
        "bv": jax.random.normal(ks[5], (D,), jnp.float32) * 0.1,
        "wo": jax.random.normal(ks[6], (D, D), jnp.float32) * scale_w,
        "bo": jax.random.normal(ks[7], (D,), jnp.float32) * 0.1,
    }
    query = jax.random.normal(ks[8], (T, B, D), jnp.float32)
    key_in = jax.random.normal(ks[9], (T, B, D), jnp.float32)
    value = jax.random.normal(ks[10], (T, B, D), jnp.float32)

    ref_out, ref_attn = reference_mha(query, key_in, value, params, NHEAD)

    # (a) Tight numeric check: f32 compute, flash path, tq=tk=8 exercises the multi-tile
    #     online-softmax accumulation (grid = (B, 2, 2)).
    prep_f32 = prepare_mha_params(params, NHEAD, compute_dtype=jnp.float32)
    out_f32, _ = multi_headed_attention(query, key_in, value, prep_f32, tq=8, tk=8)
    out_f32 = jax.block_until_ready(out_f32)
    assert out_f32.shape == (T, B, D)
    assert jnp.allclose(out_f32, ref_out, atol=2e-2, rtol=2e-2)

    # (b) Performance path: bf16 MXU operands (f32 accumulation), flash attention,
    #     no probability materialization.  Loose tolerances vs the f32 reference.
    prep = prepare_mha_params(params, NHEAD)  # bf16 fused / pre-transposed weights
    out_fast, p_none = multi_headed_attention(query, key_in, value, prep, tq=8, tk=8)
    out_fast = jax.block_until_ready(out_fast)
    assert p_none is None and out_fast.shape == (T, B, D)
    assert jnp.allclose(out_fast, ref_out, atol=1e-1, rtol=1e-1)
    assert float(jnp.mean(jnp.abs(out_fast - ref_out))) < 5e-2

    # (c) Debug path: attention probabilities materialized (non-default).
    out_dbg, attn = multi_headed_attention(query, key_in, value, prep, return_attn=True)
    out_dbg = jax.block_until_ready(out_dbg)
    attn = jax.block_until_ready(attn)
    assert attn.shape == (NHEAD, B, T, T)
    assert jnp.allclose(attn, ref_attn, atol=4e-2, rtol=4e-2)
    assert jnp.allclose(out_dbg, ref_out, atol=1e-1, rtol=1e-1)

    # (d) Self-attention fast path (single fused x @ [Wq|Wk|Wv]^T matmul).
    ref_self, _ = reference_mha(query, query, query, params, NHEAD)
    out_self, _ = multi_headed_attention(query, query, query, prep,
                                         is_self_attention=True)
    out_self = jax.block_until_ready(out_self)
    assert jnp.allclose(out_self, ref_self, atol=1e-1, rtol=1e-1)
    assert float(jnp.mean(jnp.abs(out_self - ref_self))) < 5e-2

    print("KERNEL_OK")
</pallas_src>

<mosaic_0001>
module attributes {stable_mosaic.version = 11 : i64} {
  func.func @qkv_cross_kernel(%arg0: i32, %arg1: memref<32x128xf32, #tpu.memory_space<vmem>>, %arg2: memref<32x128xf32, #tpu.memory_space<vmem>>, %arg3: memref<32x128xf32, #tpu.memory_space<vmem>>, %arg4: memref<128x384xf32, #tpu.memory_space<vmem>>, %arg5: memref<1x384xf32, #tpu.memory_space<vmem>>, %arg6: memref<32x128xf32, #tpu.memory_space<vmem>>, %arg7: memref<32x256xf32, #tpu.memory_space<vmem>>) attributes {dimension_semantics = [#tpu.dimension_semantics<parallel>], iteration_bounds = array<i64: 1>, scalar_prefetch = 0 : i64, scratch_operands = 0 : i64, tpu.core_type = #tpu.core_type<tc>, window_params = [{transform_indices = @transform_0, window_bounds = array<i64: 32, 128>}, {transform_indices = @transform_1, window_bounds = array<i64: 32, 128>}, {transform_indices = @transform_2, window_bounds = array<i64: 32, 128>}, {pipeline_mode = #tpu.pipeline_mode<synchronous>, transform_indices = @transform_3, window_bounds = array<i64: 128, 384>}, {pipeline_mode = #tpu.pipeline_mode<synchronous>, transform_indices = @transform_4, window_bounds = array<i64: 1, 384>}, {transform_indices = @transform_5, window_bounds = array<i64: 32, 128>}, {transform_indices = @transform_6, window_bounds = array<i64: 32, 256>}]} {
    %c0 = arith.constant 0 : index
    %c0_0 = arith.constant 0 : index
    %0 = vector.load %arg1[%c0, %c0_0] : memref<32x128xf32, #tpu.memory_space<vmem>>, vector<32x128xf32>
    %c0_1 = arith.constant 0 : index
    %c0_2 = arith.constant 0 : index
    %1 = vector.load %arg4[%c0_1, %c0_2] : memref<128x384xf32, #tpu.memory_space<vmem>>, vector<128x128xf32>
    %cst = arith.constant dense<0.000000e+00> : vector<32x128xf32>
    %2 = tpu.matmul %0, %1, %cst {dimension_numbers = #tpu.dot_dimension_numbers<[1], [0], [0], [1], [0, 0, 1, 1], [], []>} : vector<32x128xf32>, vector<128x128xf32>, vector<32x128xf32> -> vector<32x128xf32>
    %c0_3 = arith.constant 0 : index
    %c0_4 = arith.constant 0 : index
    %3 = vector.load %arg5[%c0_3, %c0_4] : memref<1x384xf32, #tpu.memory_space<vmem>>, vector<1x128xf32>
    %4 = vector.broadcast %3 : vector<1x128xf32> to vector<32x128xf32>
    %5 = arith.addf %2, %4 : vector<32x128xf32>
    %c0_5 = arith.constant 0 : index
    %c0_6 = arith.constant 0 : index
    %6 = vector.load %arg2[%c0_5, %c0_6] : memref<32x128xf32, #tpu.memory_space<vmem>>, vector<32x128xf32>
    %c0_7 = arith.constant 0 : index
    %c128 = arith.constant 128 : index
    %7 = vector.load %arg4[%c0_7, %c128] : memref<128x384xf32, #tpu.memory_space<vmem>>, vector<128x128xf32>
    %cst_8 = arith.constant dense<0.000000e+00> : vector<32x128xf32>
    %8 = tpu.matmul %6, %7, %cst_8 {dimension_numbers = #tpu.dot_dimension_numbers<[1], [0], [0], [1], [0, 0, 1, 1], [], []>} : vector<32x128xf32>, vector<128x128xf32>, vector<32x128xf32> -> vector<32x128xf32>
    %c0_9 = arith.constant 0 : index
    %c128_10 = arith.constant 128 : index
    %9 = vector.load %arg5[%c0_9, %c128_10] : memref<1x384xf32, #tpu.memory_space<vmem>>, vector<1x128xf32>
    %10 = vector.broadcast %9 : vector<1x128xf32> to vector<32x128xf32>
    %11 = arith.addf %8, %10 : vector<32x128xf32>
    %c0_11 = arith.constant 0 : index
    %c0_12 = arith.constant 0 : index
    %12 = vector.load %arg3[%c0_11, %c0_12] : memref<32x128xf32, #tpu.memory_space<vmem>>, vector<32x128xf32>
    %c0_13 = arith.constant 0 : index
    %c256 = arith.constant 256 : index
    %13 = vector.load %arg4[%c0_13, %c256] : memref<128x384xf32, #tpu.memory_space<vmem>>, vector<128x128xf32>
    %cst_14 = arith.constant dense<0.000000e+00> : vector<32x128xf32>
    %14 = tpu.matmul %12, %13, %cst_14 {dimension_numbers = #tpu.dot_dimension_numbers<[1], [0], [0], [1], [0, 0, 1, 1], [], []>} : vector<32x128xf32>, vector<128x128xf32>, vector<32x128xf32> -> vector<32x128xf32>
    %c0_15 = arith.constant 0 : index
    %c256_16 = arith.constant 256 : index
    %15 = vector.load %arg5[%c0_15, %c256_16] : memref<1x384xf32, #tpu.memory_space<vmem>>, vector<1x128xf32>
    %16 = vector.broadcast %15 : vector<1x128xf32> to vector<32x128xf32>
    %17 = arith.addf %14, %16 : vector<32x128xf32>
    %c0_17 = arith.constant 0 : index
    %c0_18 = arith.constant 0 : index
    %18 = vector.load %arg6[%c0_17, %c0_18] : memref<32x128xf32, #tpu.memory_space<vmem>>, vector<32x128xf32>
    tpu.vector_store %arg6[%c0_17, %c0_18], %5 {strides = array<i32>} : memref<32x128xf32, #tpu.memory_space<vmem>>, vector<32x128xf32>,
    %c0_19 = arith.constant 0 : index
    %c0_20 = arith.constant 0 : index
    %19 = vector.load %arg7[%c0_19, %c0_20] : memref<32x256xf32, #tpu.memory_space<vmem>>, vector<32x128xf32>
    tpu.vector_store %arg7[%c0_19, %c0_20], %11 {strides = array<i32>} : memref<32x256xf32, #tpu.memory_space<vmem>>, vector<32x128xf32>,
    %c0_21 = arith.constant 0 : index
    %c128_22 = arith.constant 128 : index
    %20 = vector.load %arg7[%c0_21, %c128_22] : memref<32x256xf32, #tpu.memory_space<vmem>>, vector<32x128xf32>
    tpu.vector_store %arg7[%c0_21, %c128_22], %17 {strides = array<i32>} : memref<32x256xf32, #tpu.memory_space<vmem>>, vector<32x128xf32>,
    return
  }
  func.func @transform_0(%arg0: i32) -> (i32, i32) {
    %c0_i32 = arith.constant 0 : i32
    %c0_i32_0 = arith.constant 0 : i32
    return %arg0, %c0_i32 : i32, i32
  }
  func.func @transform_1(%arg0: i32) -> (i32, i32) {
    %c0_i32 = arith.constant 0 : i32
    %c0_i32_0 = arith.constant 0 : i32
    return %arg0, %c0_i32 : i32, i32
  }
  func.func @transform_2(%arg0: i32) -> (i32, i32) {
    %c0_i32 = arith.constant 0 : i32
    %c0_i32_0 = arith.constant 0 : i32
    return %arg0, %c0_i32 : i32, i32
  }
  func.func @transform_3(%arg0: i32) -> (i32, i32) {
    %c0_i32 = arith.constant 0 : i32
    %c0_i32_0 = arith.constant 0 : i32
    %c0_i32_1 = arith.constant 0 : i32
    return %c0_i32, %c0_i32_0 : i32, i32
  }
  func.func @transform_4(%arg0: i32) -> (i32, i32) {
    %c0_i32 = arith.constant 0 : i32
    %c0_i32_0 = arith.constant 0 : i32
    %c0_i32_1 = arith.constant 0 : i32
    return %c0_i32, %c0_i32_0 : i32, i32
  }
  func.func @transform_5(%arg0: i32) -> (i32, i32) {
    %c0_i32 = arith.constant 0 : i32
    %c0_i32_0 = arith.constant 0 : i32
    return %arg0, %c0_i32 : i32, i32
  }
  func.func @transform_6(%arg0: i32) -> (i32, i32) {
    %c0_i32 = arith.constant 0 : i32
    %c0_i32_0 = arith.constant 0 : i32
    return %arg0, %c0_i32 : i32, i32
  }
}

</mosaic_0001>

<bundles_post_ra>
// kernel: tpu_custom_call.1
= control target key start
LH: loop header
LB: loop body
LE: loop exit
PB: predicated region body
PF: predicated region fallthrough
CT: control target
= control target key end

     0   :  { %12 = vsyncpa [#allocation3], 0  ;;  %s1059_s0 = inlined_call_operand.hbm [shape: f32[32,128], index: 0, kind: input, shape index: {}]   ;;  %s1060_s1 = inlined_call_operand.hbm [shape: f32[32,128], index: 1, kind: input, shape index: {}]   ;;  %s1061_s2 = inlined_call_operand.hbm [shape: f32[32,128], index: 2, kind: input, shape index: {}]   ;;  %s1062_s3 = inlined_call_operand.hbm [shape: f32[128,384], index: 3, kind: input, shape index: {}]   ;;  %s1063_s4 = inlined_call_operand.vmem [shape: f32[1,384], index: 4, kind: input, shape index: {}]   ;;  %s1064_s5 = inlined_call_operand.hbm [shape: f32[32,128], index: 5, kind: output, shape index: {0}]   ;;  %s1065_s6 = inlined_call_operand.hbm [shape: f32[32,256], index: 6, kind: output, shape index: {1}]  }
   0x1   :  { %13 = vsyncpa [#allocation6], 0 }
   0x2   :  { %14 = vsyncpa [#allocation9], 0 }
   0x3   :  { %15 = vsyncpa [#allocation4], 0 }
   0x4   :  { %16 = vsyncpa [#allocation12], 0  ;;  %s905_s21 = smov [#allocation5]   ;;  %s906_s23 = smov [#allocation2]  }
   0x5   :  { %s34_s22 = sshll.u32 %s905_s21, 4  ;;  %s22_s24 = sshll.u32 %s906_s23, 4  ;;  %s35_s22 = int_to_ptr.vmem [resolvable:$true] %s34_s22  ;;  %s952_s24 = int_to_ptr.vmem [resolvable:$true] %s22_s24 }
   0x6   :  { %s763_s27 = scalar_lea.hbm %s1060_s1, 512 }
   0x7   :  { %p764_p0 = scmp.ne.s32.totalorder %s1060_s1, %s763_s27  ;;  %p767_p1 = scmp.lt.u32.totalorder %s763_s27, %s1060_s1 }
   0x9   :  { %p769_p2 = pnand %p767_p1, %p764_p0 }
   0xb   :  { %772 = shalt.err (!%p769_p2)
}
   0xc   :  { %s773_s8 = scalar_lea.vmem %s35_s22, 512  ;;  %p778_p4 = scmp.lt.s32.totalorder %s35_s22, %s35_s22 }
   0xd   :  { %p774_p3 = scmp.ne.s32.totalorder %s35_s22, %s773_s8  ;;  %p779_p5 = scmp.lt.s32.totalorder %s773_s8, %s773_s8 }
   0xf   :  { %p780_p6 = por %p779_p5, %p778_p4 }
  0x11   :  { %p781_p7 = pnand %p780_p6, %p774_p3 }
  0x13   :  { %784 = shalt.err (!%p781_p7)
}
  0x14   :  { %s907_s9 = smov 128   ;;  %s908_s10 = smov 8  }
  0x15   :  { %40 = dma.hbm_to_vmem [thread:$0]  %s1060_s1, 512, %s35_s22, [#allocation6], %s907_s9, %s907_s9, %s908_s10  }
  0x16   :  { %s785_s15 = scalar_lea.hbm %s1059_s0, 512 }
  0x17   :  { %p786_p8 = scmp.ne.s32.totalorder %s1059_s0, %s785_s15  ;;  %p789_p9 = scmp.lt.u32.totalorder %s785_s15, %s1059_s0 }
  0x19   :  { %p791_p10 = pnand %p789_p9, %p786_p8 }
  0x1b   :  { %794 = shalt.err (!%p791_p10)
}
  0x1c   :  { %s795_s20 = scalar_lea.vmem %s952_s24, 512  ;;  %p800_p12 = scmp.lt.s32.totalorder %s952_s24, %s952_s24 }
  0x1d   :  { %p796_p11 = scmp.ne.s32.totalorder %s952_s24, %s795_s20  ;;  %p801_p13 = scmp.lt.s32.totalorder %s795_s20, %s795_s20 }
  0x1f   :  { %p802_p0 = por %p801_p13, %p800_p12 }
  0x21   :  { %p803_p1 = pnand %p802_p0, %p796_p11 }
  0x23   :  { %806 = shalt.err (!%p803_p1)
}
  0x24   :  { %28 = dma.hbm_to_vmem [thread:$0]  %s1059_s0, 512, %s952_s24, [#allocation3], %s907_s9, %s907_s9, %s908_s10  }
  0x25   :  { %s909_s22 = smov [#allocation7]   ;;  %s910_s25 = smov [#allocation8]  }
  0x26   :  { %s46_s23 = sshll.u32 %s909_s22, 4  ;;  %s58_s26 = sshll.u32 %s910_s25, 4  ;;  %s47_s23 = int_to_ptr.vmem [resolvable:$true] %s46_s23  ;;  %s989_s26 = int_to_ptr.vmem [resolvable:$true] %s58_s26 }
  0x27   :  { %s807_s29 = scalar_lea.hbm %s1061_s2, 512 }
  0x28   :  { %p808_p2 = scmp.ne.s32.totalorder %s1061_s2, %s807_s29  ;;  %p811_p3 = scmp.lt.u32.totalorder %s807_s29, %s1061_s2 }
  0x2a   :  { %p813_p4 = pnand %p811_p3, %p808_p2 }
  0x2c   :  { %816 = shalt.err (!%p813_p4)
}
  0x2d   :  { %s817_s0 = scalar_lea.vmem %s47_s23, 512  ;;  %p822_p6 = scmp.lt.s32.totalorder %s47_s23, %s47_s23 }
  0x2e   :  { %p818_p5 = scmp.ne.s32.totalorder %s47_s23, %s817_s0  ;;  %p823_p7 = scmp.lt.s32.totalorder %s817_s0, %s817_s0 }
  0x30   :  { %p824_p8 = por %p823_p7, %p822_p6 }
  0x32   :  { %p825_p9 = pnand %p824_p8, %p818_p5 }
  0x34   :  { %828 = shalt.err (!%p825_p9)
}
  0x35   :  { %52 = dma.hbm_to_vmem [thread:$0]  %s1061_s2, 512, %s47_s23, [#allocation6], %s907_s9, %s907_s9, %s908_s10  }
  0x36   :  { %s829_s15 = scalar_lea.hbm %s1062_s3, 6144 }
  0x37   :  { %p830_p10 = scmp.ne.s32.totalorder %s1062_s3, %s829_s15  ;;  %p833_p11 = scmp.lt.u32.totalorder %s829_s15, %s1062_s3 }
  0x39   :  { %p835_p12 = pnand %p833_p11, %p830_p10 }
  0x3b   :  { %838 = shalt.err (!%p835_p12)
}
  0x3c   :  { %s839_s20 = scalar_lea.vmem %s989_s26, 6144  ;;  %p844_p0 = scmp.lt.s32.totalorder %s989_s26, %s989_s26 }
  0x3d   :  { %p840_p13 = scmp.ne.s32.totalorder %s989_s26, %s839_s20  ;;  %p845_p1 = scmp.lt.s32.totalorder %s839_s20, %s839_s20 }
  0x3f   :  { %p846_p2 = por %p845_p1, %p844_p0 }
  0x41   :  { %p847_p3 = pnand %p846_p2, %p840_p13 }
  0x43   :  { %850 = shalt.err (!%p847_p3)
}
  0x44   :  { %s911_s2 = smov 384   ;;  %s912_s1 = smov 24  }
  0x45   :  { %64 = dma.hbm_to_vmem [thread:$0]  %s1062_s3, 6144, %s989_s26, [#allocation9], %s911_s2, %s911_s2, %s912_s1  }
  0x46   :  { %895 = dma.done.wait [#allocation3], 512  }
  0x47   :  { %896 = vsyncadd [#allocation3], 4294966784 }
  0x48   :  { %897 = dma.done.wait [#allocation6], 1024  }
  0x49   :  { %898 = vsyncadd [#allocation6], 4294966272 }
  0x4a   :  { %899 = dma.done.wait [#allocation9], 6144  }
  0x4b   :  { %900 = vsyncadd [#allocation9], 4294961152  ;;  %v83_v0 = vld [vmem:[#allocation8] sm:$0xff]  ;;  %v84_v1 = vld [vmem:[#allocation8 + $0x18] sm:$0xff]  ;;  %s913_s27 = smov [#allocation10]  }
  0x4c   :  { %v195_v2 = vld [vmem:[#allocation8 + $0x8] sm:$0xff]  ;;  %v639_v3 = vpack.c.bf16 %v84_v1, %v83_v0  ;;  %v196_v4 = vld [vmem:[#allocation8 + $0x20] sm:$0xff]  ;;  %v85_v5 = vld [vmem:[#allocation8 + $0x30] sm:$0xff]  ;;  %s432_s28 = sshll.u32 %s913_s27, 4  ;;  %s433_s28 = int_to_ptr.vmem [resolvable:$true] %s432_s28 }
  0x4d   :  { %v86_v6 = vld [vmem:[#allocation8 + $0x48] sm:$0xff]  ;;  %v671_v7 = vpack.c.bf16 %v196_v4, %v195_v2  ;;  %v197_v9 = vld [vmem:[#allocation8 + $0x38] sm:$0xff]  ;;  %v198_v10 = vld [vmem:[#allocation8 + $0x50] sm:$0xff]  ;;  %s851_s29 = scalar_lea.vmem %s433_s28, 512  ;;  %p856_p5 = scmp.lt.s32.totalorder %s433_s28, %s433_s28 }
  0x4e   :  { %v643_v8 = vpack.c.bf16 %v86_v6, %v85_v5  ;;  %v87_v11 = vld [vmem:[#allocation8 + $0x60] sm:$0xff]  ;;  %640 = vmatprep.subr.bf16.mxu0 %v639_v3  ;;  %v675_v12 = vpack.c.bf16 %v198_v10, %v197_v9  ;;  %v88_v13 = vld [vmem:[#allocation8 + $0x78] sm:$0xff]  ;;  %v199_v14 = vld [vmem:[#allocation8 + $0x68] sm:$0xff]  ;;  %p852_p4 = scmp.ne.s32.totalorder %s433_s28, %s851_s29  ;;  %p857_p6 = scmp.lt.s32.totalorder %s851_s29, %s851_s29 }
  0x4f   :  { %v200_v15 = vld [vmem:[#allocation8 + $0x80] sm:$0xff]  ;;  %672 = vmatprep.subr.bf16.mxu1 %v671_v7  ;;  %642 = vmatpush3.bf16.msra.mxu0 %v639_v3  ;;  %v647_v16 = vpack.c.bf16 %v88_v13, %v87_v11  ;;  %v89_v18 = vld [vmem:[#allocation8 + $0x90] sm:$0xff]  ;;  %v90_v19 = vld [vmem:[#allocation8 + $0xa8] sm:$0xff] }
  0x50   :  { %674 = vmatpush3.bf16.msra.mxu1 %v671_v7  ;;  %644 = vmatprep.subr.bf16.mxu0 %v643_v8  ;;  %v679_v17 = vpack.c.bf16 %v200_v15, %v199_v14  ;;  %v201_v20 = vld [vmem:[#allocation8 + $0x98] sm:$0xff]  ;;  %v202_v21 = vld [vmem:[#allocation8 + $0xb0] sm:$0xff]  ;;  %v651_v22 = vpack.c.bf16 %v90_v19, %v89_v18  ;;  %v91_v24 = vld [vmem:[#allocation8 + $0xc0] sm:$0xff]  ;;  %p858_p7 = por %p857_p6, %p856_p5 }
  0x51   :  { %676 = vmatprep.subr.bf16.mxu1 %v675_v12  ;;  %v683_v23 = vpack.c.bf16 %v202_v21, %v201_v20  ;;  %v92_v25 = vld [vmem:[#allocation8 + $0xd8] sm:$0xff]  ;;  %v79_v26 = vld [vmem:[#allocation2] sm:$0xff]  ;;  %v203_v27 = vld [vmem:[#allocation8 + $0xc8] sm:$0xff] }
  0x52   :  { %v204_v28 = vld [vmem:[#allocation8 + $0xe0] sm:$0xff]  ;;  %557 = vmatprep.mubr.f32.mxu0 %v79_v26  ;;  %v655_v30 = vpack.c.bf16 %v92_v25, %v91_v24  ;;  %v93_v32 = vld [vmem:[#allocation8 + $0xf0] sm:$0xff]  ;;  %v94_v33 = vld [vmem:[#allocation8 + $0x108] sm:$0xff]  ;;  %p859_p8 = pnand %p858_p7, %p852_p4 }
  0x53   :  { %646 = vmatpush3.bf16.msra.mxu0 %v643_v8  ;;  %v191_v29 = vld [vmem:[#allocation5] sm:$0xff]  ;;  %v687_v31 = vpack.c.bf16 %v204_v28, %v203_v27  ;;  %v205_v34 = vld [vmem:[#allocation8 + $0xf8] sm:$0xff]  ;;  %v206_v35 = vld [vmem:[#allocation8 + $0x110] sm:$0xff]  ;;  %v659_v36 = vpack.c.bf16 %v94_v33, %v93_v32 }
  0x54   :  { %678 = vmatpush3.bf16.msra.mxu1 %v675_v12  ;;  %648 = vmatprep.subr.bf16.mxu0 %v647_v16  ;;  %v691_v37 = vpack.c.bf16 %v206_v35, %v205_v34  ;;  %v95_v38 = vld [vmem:[#allocation8 + $0x120] sm:$0xff]  ;;  %v96_v39 = vld [vmem:[#allocation8 + $0x138] sm:$0xff]  ;;  %v207_v40 = vld [vmem:[#allocation8 + $0x128] sm:$0xff] }
  0x55   :  { %680 = vmatprep.subr.bf16.mxu1 %v679_v17  ;;  %595 = vmatprep.mubr.f32.mxu1 %v191_v29  ;;  %v208_v41 = vld [vmem:[#allocation8 + $0x140] sm:$0xff]  ;;  %v663_v42 = vpack.c.bf16 %v96_v39, %v95_v38  ;;  %v97_v44 = vld [vmem:[#allocation8 + $0x150] sm:$0xff]  ;;  %v98_v45 = vld [vmem:[#allocation8 + $0x168] sm:$0xff] }
  0x56   :  { %v695_v43 = vpack.c.bf16 %v208_v41, %v207_v40  ;;  %v209_v46 = vld [vmem:[#allocation8 + $0x158] sm:$0xff]  ;;  %v210_v47 = vld [vmem:[#allocation8 + $0x170] sm:$0xff]  ;;  %v667_v48 = vpack.c.bf16 %v98_v45, %v97_v44  ;;  %v308_v51 = vld [vmem:[#allocation8 + $0x28] sm:$0xff] }
  0x57   :  { %650 = vmatpush3.bf16.msra.mxu0 %v647_v16  ;;  %v699_v49 = vpack.c.bf16 %v210_v47, %v209_v46  ;;  %v307_v50 = vld [vmem:[#allocation8 + $0x10] sm:$0xff]  ;;  %v309_v53 = vld [vmem:[#allocation8 + $0x40] sm:$0xff]  ;;  %v310_v54 = vld [vmem:[#allocation8 + $0x58] sm:$0xff] }
  0x58   :  { %682 = vmatpush3.bf16.msra.mxu1 %v679_v17  ;;  %652 = vmatprep.subr.bf16.mxu0 %v651_v22  ;;  %v703_v52 = vpack.c.bf16 %v308_v51, %v307_v50  ;;  %v80_v55 = vld [vmem:[#allocation2 + $0x8] sm:$0xff]  ;;  %v707_v57 = vpack.c.bf16 %v310_v54, %v309_v53  ;;  %v311_v58 = vld [vmem:[#allocation8 + $0x70] sm:$0xff]  ;;  %v82_v62 = vld [vmem:[#allocation2 + $0x18] sm:$0xff] }
  0x59   :  { %684 = vmatprep.subr.bf16.mxu1 %v683_v23  ;;  %v192_v56 = vld [vmem:[#allocation5 + $0x8] sm:$0xff]  ;;  %v81_v60 = vld [vmem:[#allocation2 + $0x10] sm:$0xff]  ;;  %v194_v0 = vld [vmem:[#allocation5 + $0x18] sm:$0xff] }
  0x5a   :  { %v312_v59 = vld [vmem:[#allocation8 + $0x88] sm:$0xff]  ;;  %v193_v61 = vld [vmem:[#allocation5 + $0x10] sm:$0xff]  ;;  %v313_v1 = vld [vmem:[#allocation8 + $0xa0] sm:$0xff] }
  0x5b   :  { %654 = vmatpush3.bf16.msra.mxu0 %v651_v22  ;;  %v711_v63 = vpack.c.bf16 %v312_v59, %v311_v58  ;;  %v314_v2 = vld [vmem:[#allocation8 + $0xb8] sm:$0xff]  ;;  %v303_v3 = vld [vmem:[#allocation7] sm:$0xff]  ;;  %v305_v4 = vld [vmem:[#allocation7 + $0x10] sm:$0xff] }
  0x5c   :  { %686 = vmatpush3.bf16.msra.mxu1 %v683_v23  ;;  %656 = vmatprep.subr.bf16.mxu0 %v655_v30  ;;  %v715_v5 = vpack.c.bf16 %v314_v2, %v313_v1  ;;  %v315_v6 = vld [vmem:[#allocation8 + $0xd0] sm:$0xff]  ;;  %v316_v7 = vld [vmem:[#allocation8 + $0xe8] sm:$0xff]  ;;  %v317_v9 = vld [vmem:[#allocation8 + $0x100] sm:$0xff] }
  0x5d   :  { %688 = vmatprep.subr.bf16.mxu1 %v687_v31  ;;  %v719_v8 = vpack.c.bf16 %v316_v7, %v315_v6  ;;  %v318_v10 = vld [vmem:[#allocation8 + $0x118] sm:$0xff]  ;;  %v319_v12 = vld [vmem:[#allocation8 + $0x130] sm:$0xff]  ;;  %v320_v13 = vld [vmem:[#allocation8 + $0x148] sm:$0xff] }
  0x5e   :  { %v723_v11 = vpack.c.bf16 %v318_v10, %v317_v9  ;;  %v727_v14 = vpack.c.bf16 %v320_v13, %v319_v12  ;;  %v321_v15 = vld [vmem:[#allocation8 + $0x160] sm:$0xff]  ;;  %v322_v16 = vld [vmem:[#allocation8 + $0x178] sm:$0xff]  ;;  %v304_v18 = vld [vmem:[#allocation7 + $0x8] sm:$0xff] }
  0x5f   :  { %658 = vmatpush3.bf16.msra.mxu0 %v655_v30  ;;  %v731_v17 = vpack.c.bf16 %v322_v16, %v321_v15  ;;  %v306_v19 = vld [vmem:[#allocation7 + $0x18] sm:$0xff]  ;;  %v462_v20 = vld [vmem:[%s1063_s4] ss:$0 sm:$0xff]  ;;  %v463_v21 = vld [vmem:[%s1063_s4 + $0x1] ss:$0 sm:$0xff] }
  0x60   :  { %690 = vmatpush3.bf16.msra.mxu1 %v687_v31  ;;  %660 = vmatprep.subr.bf16.mxu0 %v659_v36 }
  0x61   :  { %692 = vmatprep.subr.bf16.mxu1 %v691_v37 }
  0x63   :  { %662 = vmatpush3.bf16.msra.mxu0 %v659_v36 }
  0x64   :  { %694 = vmatpush3.bf16.msra.mxu1 %v691_v37  ;;  %664 = vmatprep.subr.bf16.mxu0 %v663_v42 }
  0x65   :  { %696 = vmatprep.subr.bf16.mxu1 %v695_v43 }
  0x67   :  { %666 = vmatpush3.bf16.msra.mxu0 %v663_v42 }
  0x68   :  { %698 = vmatpush3.bf16.msra.mxu1 %v695_v43  ;;  %668 = vmatprep.subr.bf16.mxu0 %v667_v48 }
  0x69   :  { %700 = vmatprep.subr.bf16.mxu1 %v699_v49 }
  0x6b   :  { %670 = vmatpush3.bf16.msra.mxu0 %v667_v48 }
  0x6c   :  { %702 = vmatpush3.bf16.msra.mxu1 %v699_v49  ;;  %704 = vmatprep.subr.bf16.mxu0 %v703_v52 }
  0x6d   :  { %735 = vmatprep.subr.bf16.mxu1 %v703_v52 }
  0x6e   :  { %558 = vmatmul.mubr.f32.vlgmr.msra.gmra.mrb[0].mxu0 %v80_v55 }
  0x6f   :  { %596 = vmatmul.mubr.f32.vlgmr.msra.gmra.mrb[0].mxu1 %v192_v56  ;;  %706 = vmatpush3.bf16.msra.mxu0 %v703_v52 }
  0x70   :  { %743 = vmatpush3.bf16.msra.mxu1 %v703_v52  ;;  %708 = vmatprep.subr.bf16.mxu0 %v707_v57 }
  0x71   :  { %736 = vmatprep.subr.bf16.mxu1 %v707_v57  ;;  %560 = vmatprep.mubr.f32.mxu0 %v81_v60 }
  0x72   :  { %598 = vmatprep.mubr.f32.mxu1 %v193_v61  ;;  %561 = vmatmul.mubr.f32.gmra.mrb[2].mxu0 %v82_v62 }
  0x73   :  { %710 = vmatpush3.bf16.msra.mxu0 %v707_v57  ;;  %599 = vmatmul.mubr.f32.gmra.mrb[2].mxu1 %v194_v0 }
  0x74   :  { %744 = vmatpush3.bf16.msra.mxu1 %v707_v57  ;;  %712 = vmatprep.subr.bf16.mxu0 %v711_v63 }
  0x75   :  { %737 = vmatprep.subr.bf16.mxu1 %v711_v63  ;;  %633 = vmatprep.mubr.f32.mxu0 %v303_v3 }
  0x76   :  { %636 = vmatprep.mubr.f32.mxu1 %v305_v4 }
  0x77   :  { %714 = vmatpush3.bf16.msra.mxu0 %v711_v63 }
  0x78   :  { %745 = vmatpush3.bf16.msra.mxu1 %v711_v63  ;;  %716 = vmatprep.subr.bf16.mxu0 %v715_v5 }
  0x79   :  { %738 = vmatprep.subr.bf16.mxu1 %v715_v5 }
  0x7b   :  { %718 = vmatpush3.bf16.msra.mxu0 %v715_v5 }
  0x7c   :  { %746 = vmatpush3.bf16.msra.mxu1 %v715_v5  ;;  %720 = vmatprep.subr.bf16.mxu0 %v719_v8 }
  0x7d   :  { %739 = vmatprep.subr.bf16.mxu1 %v719_v8 }
  0x7f   :  { %722 = vmatpush3.bf16.msra.mxu0 %v719_v8 }
  0x80   :  { %747 = vmatpush3.bf16.msra.mxu1 %v719_v8  ;;  %724 = vmatprep.subr.bf16.mxu0 %v723_v11 }
  0x81   :  { %740 = vmatprep.subr.bf16.mxu1 %v723_v11 }
  0x83   :  { %726 = vmatpush3.bf16.msra.mxu0 %v723_v11 }
  0x84   :  { %748 = vmatpush3.bf16.msra.mxu1 %v723_v11  ;;  %728 = vmatprep.subr.bf16.mxu0 %v727_v14 }
  0x85   :  { %741 = vmatprep.subr.bf16.mxu1 %v727_v14 }
  0x87   :  { %730 = vmatpush3.bf16.msra.mxu0 %v727_v14 }
  0x88   :  { %749 = vmatpush3.bf16.msra.mxu1 %v727_v14  ;;  %732 = vmatprep.subr.bf16.mxu0 %v731_v17 }
  0x89   :  { %742 = vmatprep.subr.bf16.mxu1 %v731_v17 }
  0x8b   :  { %734 = vmatpush3.bf16.msra.mxu0 %v731_v17 }
  0x8c   :  { %750 = vmatpush3.bf16.msra.mxu1 %v731_v17 }
  0x8e   :  { %634 = vmatmul.mubr.f32.vlgmr.msra.gmra.mrb[4].mxu0 %v304_v18 }
  0x8f   :  { %637 = vmatmul.mubr.f32.vlgmr.msra.gmra.mrb[4].mxu1 %v306_v19 }
 0x141   :  { %v559_v22 = vpop.f32.mrb[0].mxu0 }
 0x142   :  { %v178_v23 = vadd.f32 %v559_v22, %v462_v20  ;;  %v597_v24 = vpop.f32.mrb[0].mxu1  ;;  %v172_v25 = vpop.f32.mrb[1].mxu0 }
 0x143   :  { %v290_v26 = vadd.f32 %v597_v24, %v463_v21  ;;  %v173_v27 = vadd.f32 %v462_v20, %v172_v25  ;;  %v284_v28 = vpop.f32.mrb[1].mxu1 }
 0x144   :  { %416 = vst [vmem:[#allocation10 + $0x8] sm:$0xff] %v178_v23  ;;  %v285_v29 = vadd.f32 %v463_v21, %v284_v28 }
 0x145   :  { %420 = vst [vmem:[#allocation11 + $0x10] sm:$0xff] %v290_v26  ;;  %415 = vst [vmem:[#allocation10] sm:$0xff] %v173_v27  ;;  %v562_v30 = vpop.f32.mrb[2].mxu0 }
 0x146   :  { %419 = vst [vmem:[#allocation11] sm:$0xff] %v285_v29  ;;  %v188_v31 = vadd.f32 %v562_v30, %v462_v20  ;;  %v600_v32 = vpop.f32.mrb[2].mxu1  ;;  %v182_v33 = vpop.f32.mrb[3].mxu0 }
 0x147   :  { %v300_v34 = vadd.f32 %v600_v32, %v463_v21  ;;  %v183_v35 = vadd.f32 %v462_v20, %v182_v33  ;;  %v294_v36 = vpop.f32.mrb[3].mxu1 }
 0x148   :  { %418 = vst [vmem:[#allocation10 + $0x18] sm:$0xff] %v188_v31  ;;  %v295_v37 = vadd.f32 %v463_v21, %v294_v36 }
 0x149   :  { %422 = vst [vmem:[#allocation11 + $0x30] sm:$0xff] %v300_v34  ;;  %417 = vst [vmem:[#allocation10 + $0x10] sm:$0xff] %v183_v35 }
 0x14a   :  { %421 = vst [vmem:[#allocation11 + $0x20] sm:$0xff] %v295_v37 }
 0x14b   :  { %862 = shalt.err (!%p859_p8)
}
 0x14c   :  { %s863_s8 = scalar_lea.hbm %s1064_s5, 512 }
 0x14d   :  { %p864_p9 = scmp.ne.s32.totalorder %s1064_s5, %s863_s8  ;;  %p867_p10 = scmp.lt.u32.totalorder %s863_s8, %s1064_s5 }
 0x14f   :  { %p869_p11 = pnand %p867_p10, %p864_p9 }
 0x151   :  { %872 = shalt.err (!%p869_p11)
}
 0x152   :  { %438 = dma.vmem_to_hbm [thread:$0]  %s433_s28, 512, %s1064_s5, [#allocation4], %s907_s9, %s907_s9, %s908_s10  }
 0x153   :  { %v464_v38 = vld [vmem:[%s1063_s4 + $0x2] ss:$0 sm:$0xff]  ;;  %s914_s17 = smov [#allocation11]  }
 0x154   :  { %s444_s18 = sshll.u32 %s914_s17, 4  ;;  %s445_s18 = int_to_ptr.vmem [resolvable:$true] %s444_s18 }
 0x155   :  { %s873_s5 = scalar_lea.vmem %s445_s18, 1024  ;;  %p878_p13 = scmp.lt.s32.totalorder %s445_s18, %s445_s18 }
 0x156   :  { %p874_p12 = scmp.ne.s32.totalorder %s445_s18, %s873_s5  ;;  %p879_p0 = scmp.lt.s32.totalorder %s873_s5, %s873_s5 }
 0x158   :  { %p880_p1 = por %p879_p0, %p878_p13 }
 0x15a   :  { %p881_p2 = pnand %p880_p1, %p874_p12 }
 0x161   :  { %v635_v39 = vpop.f32.mrb[4].mxu0 }
 0x162   :  { %v402_v40 = vadd.f32 %v635_v39, %v464_v38  ;;  %v638_v41 = vpop.f32.mrb[4].mxu1  ;;  %v396_v42 = vpop.f32.mrb[5].mxu0 }
 0x163   :  { %v412_v43 = vadd.f32 %v638_v41, %v464_v38  ;;  %v397_v44 = vadd.f32 %v464_v38, %v396_v42  ;;  %v406_v45 = vpop.f32.mrb[5].mxu1 }
 0x164   :  { %424 = vst [vmem:[#allocation11 + $0x18] sm:$0xff] %v402_v40  ;;  %v407_v46 = vadd.f32 %v464_v38, %v406_v45 }
 0x165   :  { %426 = vst [vmem:[#allocation11 + $0x38] sm:$0xff] %v412_v43  ;;  %423 = vst [vmem:[#allocation11 + $0x8] sm:$0xff] %v397_v44 }
 0x166   :  { %425 = vst [vmem:[#allocation11 + $0x28] sm:$0xff] %v407_v46 }
 0x167   :  { %884 = shalt.err (!%p881_p2)
}
 0x168   :  { %s885_s10 = scalar_lea.hbm %s1065_s6, 1024 }
 0x169   :  { %p886_p3 = scmp.ne.s32.totalorder %s1065_s6, %s885_s10  ;;  %p889_p4 = scmp.lt.u32.totalorder %s885_s10, %s1065_s6 }
 0x16b   :  { %p891_p5 = pnand %p889_p4, %p886_p3 }
 0x16d   :  { %894 = shalt.err (!%p891_p5)
}
 0x16e   :  { %s915_s21 = smov 256   ;;  %s916_s22 = smov 16  }
 0x16f   :  { %450 = dma.vmem_to_hbm [thread:$0]  %s445_s18, 1024, %s1065_s6, [#allocation12], %s915_s21, %s915_s21, %s916_s22  }
 0x170   :  { %901 = dma.done.wait [#allocation4], 512  }
 0x171   :  { %902 = vsyncadd [#allocation4], 4294966784 }
 0x172   :  { %903 = dma.done.wait [#allocation12], 1024  }
 0x173   :  { %904 = vsyncadd [#allocation12], 4294966272 }
 0x174   :  { %457 = vsyncpa [#allocation3], 1 }
 0x175   :  { %458 = vsyncpa [#allocation6], 1 }
 0x176   :  { %459 = vsyncpa [#allocation9], 1 }
 0x177   :  { %460 = vsyncpa [#allocation4], 1 }
 0x178   :  { %461 = vsyncpa [#allocation12], 1 }

</bundles_post_ra>
